<compile_context>
chip_gen: v7x
topology: tpu7x:2x2x1
jax: 0.10.0
libtpu: 0.0.40
codegen_flags: <defaults>
</compile_context>

<pallas_src>
import jax
import jax.numpy as jnp
from jax.experimental import pallas as pl
from jax.experimental.pallas import tpu as pltpu


def _fused_embed_kernel(v_ref, wo_ref, sh_ref, wa_ref,
                        w1_ref, b1_ref, w2_ref, b2_ref, o_ref):
    # v/wo/sh/wa : (tm, D_in) input tiles (one per branch)
    # w1_ref     : (4*D_in, 4*H) block-diagonal layer-1 weights
    # b1_ref     : (1, 4*H)
    # w2_ref     : (4*H, 4*H)    block-diagonal layer-2 weights
    # b2_ref     : (1, 4*H)
    # o_ref      : (tm, 4*H)     lane-dense output slab
    d = v_ref.shape[-1]
    # Layer 1: four partial MXU dots against the row-blocks of the
    # block-diagonal W1.  Each branch only populates its own 32-lane column
    # block (off-diagonal blocks are zero), so branches never mix and no lane
    # concatenates / shuffles are needed anywhere in the kernel.
    h = jnp.dot(v_ref[...], w1_ref[0 * d:1 * d, :], preferred_element_type=jnp.float32)
    h = h + jnp.dot(wo_ref[...], w1_ref[1 * d:2 * d, :], preferred_element_type=jnp.float32)
    h = h + jnp.dot(sh_ref[...], w1_ref[2 * d:3 * d, :], preferred_element_type=jnp.float32)
    h = h + jnp.dot(wa_ref[...], w1_ref[3 * d:4 * d, :], preferred_element_type=jnp.float32)
    h = jnp.maximum(h + b1_ref[...], 0.0)
    # Layer 2: one (tm, 128) x (128, 128) MXU pass.
    y = jnp.dot(h, w2_ref[...], preferred_element_type=jnp.float32)
    o_ref[...] = jnp.maximum(y + b2_ref[...], 0.0).astype(o_ref.dtype)


def _block_diag(mats):
    """Block-diagonal assembly of 2-D matrices (off-diagonal blocks are zeros)."""
    n = len(mats)
    rows = []
    for i, m in enumerate(mats):
        row = [m if j == i else jnp.zeros((m.shape[0], mats[j].shape[1]), m.dtype)
               for j in range(n)]
        rows.append(jnp.concatenate(row, axis=1))
    return jnp.concatenate(rows, axis=0)


def pack_embed_params(w1s, b1s, w2s, b2s):
    """ONE-TIME packing (module __init__), not part of the per-call path.

    w1s: (4, D_in, H)   b1s: (4, H)   w2s: (4, H, H)   b2s: (4, H)
    Branch order along axis 0: [velocity, wolf, sheep, wall].
    Weights must be (in_features, out_features) == torch nn.Linear.weight.T.
    """
    n, d_in, hidden = w1s.shape
    assert n == 4
    assert w2s.shape == (n, hidden, hidden)
    assert b1s.shape == (n, hidden) and b2s.shape == (n, hidden)
    w1_blk = _block_diag([w1s[g] for g in range(n)])       # (4*D_in, 4*H)
    w2_blk = _block_diag([w2s[g] for g in range(n)])       # (4*H,    4*H)
    b1_cat = b1s.reshape(1, n * hidden)                    # (1, 4*H)
    b2_cat = b2s.reshape(1, n * hidden)                    # (1, 4*H)
    return w1_blk, b1_cat, w2_blk, b2_cat


def embed_sheep_wolf_pallas(velocity, wolf_gf, sheep_gf, wall_gf, packed,
                            *, block_m=512):
    """Fused Embed_sheep_wolf forward.

    velocity/wolf_gf/sheep_gf/wall_gf : (B, D_in) each
    packed : output of pack_embed_params (built once at init)
    Returns the lane-dense slab (B, 4*H), ordered [velocity|wolf|sheep|wall]
    along the last axis.  Prefer consuming the slab; use split_embed_slab in
    the caller if the 4-tuple API is strictly required.
    """
    w1_blk, b1_cat, w2_blk, b2_cat = packed
    B, d_in = velocity.shape
    n_out = b1_cat.shape[-1]            # 4 * hidden_dim
    dtype = velocity.dtype

    flops = 2 * B * (4 * d_in) * n_out + 2 * B * n_out * n_out
    bytes_accessed = int(
        velocity.dtype.itemsize * (4 * B * d_in + B * n_out)
        + w1_blk.dtype.itemsize * (w1_blk.size + w2_blk.size
                                   + b1_cat.size + b2_cat.size))
    cost = pl.CostEstimate(flops=flops, transcendentals=0,
                           bytes_accessed=bytes_accessed)

    args = (velocity, wolf_gf, sheep_gf, wall_gf, w1_blk, b1_cat, w2_blk, b2_cat)
    vmem = pltpu.MemorySpace.VMEM

    if B <= block_m:
        # Grid-less: whole problem resident in VMEM, single invocation
        # (a grid's per-step overhead would exceed the compute at this size).
        return pl.pallas_call(
            _fused_embed_kernel,
            out_shape=jax.ShapeDtypeStruct((B, n_out), dtype),
            in_specs=[pl.BlockSpec(memory_space=vmem)] * len(args),
            out_specs=pl.BlockSpec(memory_space=vmem),
            cost_estimate=cost,
        )(*args)

    # Large batch: tile the batch axis; ~100 KiB of packed weights stay
    # resident across all tiles, activations are double-buffered, and the
    # batch axis is megacore-parallel (v7x: 2 TCs split the tiles).
    x_spec = pl.BlockSpec((block_m, d_in), lambda i: (i, 0), memory_space=vmem)
    w1_spec = pl.BlockSpec(w1_blk.shape, lambda i: (0, 0), memory_space=vmem)
    b1_spec = pl.BlockSpec(b1_cat.shape, lambda i: (0, 0), memory_space=vmem)
    w2_spec = pl.BlockSpec(w2_blk.shape, lambda i: (0, 0), memory_space=vmem)
    b2_spec = pl.BlockSpec(b2_cat.shape, lambda i: (0, 0), memory_space=vmem)
    out_spec = pl.BlockSpec((block_m, n_out), lambda i: (i, 0), memory_space=vmem)
    return pl.pallas_call(
        _fused_embed_kernel,
        out_shape=jax.ShapeDtypeStruct((B, n_out), dtype),
        grid=(pl.cdiv(B, block_m),),
        in_specs=[x_spec, x_spec, x_spec, x_spec,
                  w1_spec, b1_spec, w2_spec, b2_spec],
        out_specs=out_spec,
        compiler_params=pltpu.CompilerParams(dimension_semantics=("parallel",)),
        cost_estimate=cost,
    )(*args)


def split_embed_slab(slab, hidden_dim):
    """Split the (B, 4*H) slab into the module's 4-tuple.

    NOTE: on TPU these slices are separate XLA ops (lane-sparse copies), not
    views.  Do this in the consumer where it can fuse, or keep the slab.
    """
    return tuple(slab[:, g * hidden_dim:(g + 1) * hidden_dim] for g in range(4))


def reference(velocity, wolf_gf, sheep_gf, wall_gf, w1s, b1s, w2s, b2s):
    xs = (velocity, wolf_gf, sheep_gf, wall_gf)
    outs = []
    for g in range(4):
        h = jnp.maximum(xs[g] @ w1s[g] + b1s[g], 0.0)
        outs.append(jnp.maximum(h @ w2s[g] + b2s[g], 0.0))
    return tuple(outs)


if __name__ == "__main__":
    # Shapes consistent with the module: 4 branches, batch=8, input_dim=16,
    # hidden_dim=32 (so 4*H = 128 -> one full vreg of lanes).
    input_dim, hidden_dim, batch = 16, 32, 8
    n_branch = 4  # velocity, wolf, sheep, wall

    key = jax.random.PRNGKey(0)
    k_x, k_w1, k_b1, k_w2, k_b2, k_x2 = jax.random.split(key, 6)

    xs = jax.random.normal(k_x, (n_branch, batch, input_dim), jnp.float32)
    w1s = 0.1 * jax.random.normal(k_w1, (n_branch, input_dim, hidden_dim), jnp.float32)
    b1s = 0.1 * jax.random.normal(k_b1, (n_branch, hidden_dim), jnp.float32)
    w2s = 0.1 * jax.random.normal(k_w2, (n_branch, hidden_dim, hidden_dim), jnp.float32)
    b2s = 0.1 * jax.random.normal(k_b2, (n_branch, hidden_dim), jnp.float32)

    # One-time packing (== module __init__); NOT part of the per-call path.
    packed = jax.block_until_ready(pack_embed_params(w1s, b1s, w2s, b2s))

    fwd = jax.jit(embed_sheep_wolf_pallas)

    # --- small batch: grid-less path ---------------------------------------
    velocity, wolf_gf, sheep_gf, wall_gf = xs[0], xs[1], xs[2], xs[3]
    slab = jax.block_until_ready(fwd(velocity, wolf_gf, sheep_gf, wall_gf, packed))
    assert slab.shape == (batch, n_branch * hidden_dim)

    refs = reference(velocity, wolf_gf, sheep_gf, wall_gf, w1s, b1s, w2s, b2s)
    ref_slab = jnp.concatenate(refs, axis=-1)
    assert jnp.allclose(slab, ref_slab, atol=1e-4, rtol=1e-4)

    # 4-tuple API (matching the torch module's return) — split in the caller.
    velocity_embed, wolf_embed, sheep_embed, wall_embed = split_embed_slab(slab, hidden_dim)
    for o, r in zip((velocity_embed, wolf_embed, sheep_embed, wall_embed), refs):
        assert o.shape == (batch, hidden_dim)
        assert jnp.allclose(o, r, atol=1e-4, rtol=1e-4)

    # --- large batch: tiled (batch-grid, megacore-parallel) path ------------
    big_batch = 2048
    xs_big = jax.random.normal(k_x2, (n_branch, big_batch, input_dim), jnp.float32)
    slab_big = jax.block_until_ready(
        fwd(xs_big[0], xs_big[1], xs_big[2], xs_big[3], packed))
    refs_big = reference(xs_big[0], xs_big[1], xs_big[2], xs_big[3],
                         w1s, b1s, w2s, b2s)
    assert slab_big.shape == (big_batch, n_branch * hidden_dim)
    assert jnp.allclose(slab_big, jnp.concatenate(refs_big, axis=-1),
                        atol=1e-4, rtol=1e-4)

    print("KERNEL_OK")
</pallas_src>

<mosaic_0001>
module attributes {stable_mosaic.version = 11 : i64} {
  func.func @_fused_embed_kernel(%arg0: memref<8x16xf32, #tpu.memory_space<vmem>>, %arg1: memref<8x16xf32, #tpu.memory_space<vmem>>, %arg2: memref<8x16xf32, #tpu.memory_space<vmem>>, %arg3: memref<8x16xf32, #tpu.memory_space<vmem>>, %arg4: memref<64x128xf32, #tpu.memory_space<vmem>>, %arg5: memref<1x128xf32, #tpu.memory_space<vmem>>, %arg6: memref<128x128xf32, #tpu.memory_space<vmem>>, %arg7: memref<1x128xf32, #tpu.memory_space<vmem>>, %arg8: memref<8x128xf32, #tpu.memory_space<vmem>>) attributes {dimension_semantics = [], scalar_prefetch = 0 : i64, scratch_operands = 0 : i64, tpu.core_type = #tpu.core_type<tc>} {
    %c0 = arith.constant 0 : index
    %c0_0 = arith.constant 0 : index
    %0 = vector.load %arg0[%c0, %c0_0] : memref<8x16xf32, #tpu.memory_space<vmem>>, vector<8x16xf32>
    %c0_1 = arith.constant 0 : index
    %c0_2 = arith.constant 0 : index
    %1 = vector.load %arg4[%c0_1, %c0_2] : memref<64x128xf32, #tpu.memory_space<vmem>>, vector<16x128xf32>
    %cst = arith.constant dense<0.000000e+00> : vector<8x128xf32>
    %2 = tpu.matmul %0, %1, %cst {dimension_numbers = #tpu.dot_dimension_numbers<[1], [0], [0], [1], [0, 0, 1, 1], [], []>} : vector<8x16xf32>, vector<16x128xf32>, vector<8x128xf32> -> vector<8x128xf32>
    %c0_3 = arith.constant 0 : index
    %c0_4 = arith.constant 0 : index
    %3 = vector.load %arg1[%c0_3, %c0_4] : memref<8x16xf32, #tpu.memory_space<vmem>>, vector<8x16xf32>
    %c16 = arith.constant 16 : index
    %c0_5 = arith.constant 0 : index
    %4 = vector.load %arg4[%c16, %c0_5] : memref<64x128xf32, #tpu.memory_space<vmem>>, vector<16x128xf32>
    %cst_6 = arith.constant dense<0.000000e+00> : vector<8x128xf32>
    %5 = tpu.matmul %3, %4, %cst_6 {dimension_numbers = #tpu.dot_dimension_numbers<[1], [0], [0], [1], [0, 0, 1, 1], [], []>} : vector<8x16xf32>, vector<16x128xf32>, vector<8x128xf32> -> vector<8x128xf32>
    %6 = arith.addf %2, %5 : vector<8x128xf32>
    %c0_7 = arith.constant 0 : index
    %c0_8 = arith.constant 0 : index
    %7 = vector.load %arg2[%c0_7, %c0_8] : memref<8x16xf32, #tpu.memory_space<vmem>>, vector<8x16xf32>
    %c32 = arith.constant 32 : index
    %c0_9 = arith.constant 0 : index
    %8 = vector.load %arg4[%c32, %c0_9] : memref<64x128xf32, #tpu.memory_space<vmem>>, vector<16x128xf32>
    %cst_10 = arith.constant dense<0.000000e+00> : vector<8x128xf32>
    %9 = tpu.matmul %7, %8, %cst_10 {dimension_numbers = #tpu.dot_dimension_numbers<[1], [0], [0], [1], [0, 0, 1, 1], [], []>} : vector<8x16xf32>, vector<16x128xf32>, vector<8x128xf32> -> vector<8x128xf32>
    %10 = arith.addf %6, %9 : vector<8x128xf32>
    %c0_11 = arith.constant 0 : index
    %c0_12 = arith.constant 0 : index
    %11 = vector.load %arg3[%c0_11, %c0_12] : memref<8x16xf32, #tpu.memory_space<vmem>>, vector<8x16xf32>
    %c48 = arith.constant 48 : index
    %c0_13 = arith.constant 0 : index
    %12 = vector.load %arg4[%c48, %c0_13] : memref<64x128xf32, #tpu.memory_space<vmem>>, vector<16x128xf32>
    %cst_14 = arith.constant dense<0.000000e+00> : vector<8x128xf32>
    %13 = tpu.matmul %11, %12, %cst_14 {dimension_numbers = #tpu.dot_dimension_numbers<[1], [0], [0], [1], [0, 0, 1, 1], [], []>} : vector<8x16xf32>, vector<16x128xf32>, vector<8x128xf32> -> vector<8x128xf32>
    %14 = arith.addf %10, %13 : vector<8x128xf32>
    %c0_15 = arith.constant 0 : index
    %c0_16 = arith.constant 0 : index
    %15 = vector.load %arg5[%c0_15, %c0_16] : memref<1x128xf32, #tpu.memory_space<vmem>>, vector<1x128xf32>
    %16 = vector.broadcast %15 : vector<1x128xf32> to vector<8x128xf32>
    %17 = arith.addf %14, %16 : vector<8x128xf32>
    %cst_17 = arith.constant 0.000000e+00 : f32
    %18 = vector.broadcast %cst_17 : f32 to vector<8x128xf32>
    %19 = arith.maximumf %17, %18 : vector<8x128xf32>
    %c0_18 = arith.constant 0 : index
    %c0_19 = arith.constant 0 : index
    %20 = vector.load %arg6[%c0_18, %c0_19] : memref<128x128xf32, #tpu.memory_space<vmem>>, vector<128x128xf32>
    %cst_20 = arith.constant dense<0.000000e+00> : vector<8x128xf32>
    %21 = tpu.matmul %19, %20, %cst_20 {dimension_numbers = #tpu.dot_dimension_numbers<[1], [0], [0], [1], [0, 0, 1, 1], [], []>} : vector<8x128xf32>, vector<128x128xf32>, vector<8x128xf32> -> vector<8x128xf32>
    %c0_21 = arith.constant 0 : index
    %c0_22 = arith.constant 0 : index
    %22 = vector.load %arg7[%c0_21, %c0_22] : memref<1x128xf32, #tpu.memory_space<vmem>>, vector<1x128xf32>
    %23 = vector.broadcast %22 : vector<1x128xf32> to vector<8x128xf32>
    %24 = arith.addf %21, %23 : vector<8x128xf32>
    %cst_23 = arith.constant 0.000000e+00 : f32
    %25 = vector.broadcast %cst_23 : f32 to vector<8x128xf32>
    %26 = arith.maximumf %24, %25 : vector<8x128xf32>
    %c0_24 = arith.constant 0 : index
    %c0_25 = arith.constant 0 : index
    %27 = vector.load %arg8[%c0_24, %c0_25] : memref<8x128xf32, #tpu.memory_space<vmem>>, vector<8x128xf32>
    tpu.vector_store %arg8[%c0_24, %c0_25], %26 {strides = array<i32>} : memref<8x128xf32, #tpu.memory_space<vmem>>, vector<8x128xf32>,
    return
  }
}

</mosaic_0001>

<bundles_post_ra>
// kernel: embed_sheep_wolf_pallas.1
= control target key start
LH: loop header
LB: loop body
LE: loop exit
PB: predicated region body
PF: predicated region fallthrough
CT: control target
= control target key end

     0   :  { %13 = vsyncpa [#allocation3], 0  ;;  %s976_s0 = inlined_call_operand.hbm [shape: f32[8,16], index: 0, kind: input, shape index: {}]   ;;  %s977_s1 = inlined_call_operand.hbm [shape: f32[8,16], index: 1, kind: input, shape index: {}]   ;;  %s978_s2 = inlined_call_operand.hbm [shape: f32[8,16], index: 2, kind: input, shape index: {}]   ;;  %s979_s3 = inlined_call_operand.vmem [shape: f32[8,16], index: 3, kind: input, shape index: {}]   ;;  %s980_s4 = inlined_call_operand.hbm [shape: f32[64,128], index: 4, kind: input, shape index: {}]   ;;  %s981_s5 = inlined_call_operand.vmem [shape: f32[1,128], index: 5, kind: input, shape index: {}]   ;;  %s982_s6 = inlined_call_operand.hbm [shape: f32[128,128], index: 6, kind: input, shape index: {}]   ;;  %s983_s7 = inlined_call_operand.vmem [shape: f32[1,128], index: 7, kind: input, shape index: {}]   ;;  %s984_s8 = inlined_call_operand.hbm [shape: f32[8,128], index: 8, kind: output, shape index: {}]  }
   0x1   :  { %14 = vsyncpa [#allocation6], 0 }
   0x2   :  { %15 = vsyncpa [#allocation9], 0 }
   0x3   :  { %16 = vsyncpa [#allocation4], 0  ;;  %s805_s27 = smov [#allocation5]   ;;  %s806_s29 = smov [#allocation8]  }
   0x4   :  { %s33_s28 = sshll.u32 %s805_s27, 4  ;;  %s54_s30 = sshll.u32 %s806_s29, 4  ;;  %s34_s28 = int_to_ptr.vmem [resolvable:$true] %s33_s28  ;;  %s861_s30 = int_to_ptr.vmem [resolvable:$true] %s54_s30 }
   0x5   :  { %s665_s11 = scalar_lea.hbm %s977_s1, 128 }
   0x6   :  { %p666_p0 = scmp.ne.s32.totalorder %s977_s1, %s665_s11  ;;  %p669_p1 = scmp.lt.u32.totalorder %s665_s11, %s977_s1 }
   0x8   :  { %p671_p2 = pnand %p669_p1, %p666_p0 }
   0xa   :  { %674 = shalt.err (!%p671_p2)
}
   0xb   :  { %s675_s16 = scalar_lea.vmem %s34_s28, 128  ;;  %p680_p4 = scmp.lt.s32.totalorder %s34_s28, %s34_s28 }
   0xc   :  { %p676_p3 = scmp.ne.s32.totalorder %s34_s28, %s675_s16  ;;  %p681_p5 = scmp.lt.s32.totalorder %s675_s16, %s675_s16 }
   0xe   :  { %p682_p6 = por %p681_p5, %p680_p4 }
  0x10   :  { %p683_p7 = pnand %p682_p6, %p676_p3 }
  0x12   :  { %686 = shalt.err (!%p683_p7)
}
  0x13   :  { %36 = dma.hbm_to_vmem [thread:$0]  %s977_s1, 128, %s34_s28, [#allocation6]  }
  0x14   :  { %s687_s21 = scalar_lea.hbm %s980_s4, 1024 }
  0x15   :  { %p688_p8 = scmp.ne.s32.totalorder %s980_s4, %s687_s21  ;;  %p691_p9 = scmp.lt.u32.totalorder %s687_s21, %s980_s4 }
  0x17   :  { %p693_p10 = pnand %p691_p9, %p688_p8 }
  0x19   :  { %696 = shalt.err (!%p693_p10)
}
  0x1a   :  { %s697_s26 = scalar_lea.vmem %s861_s30, 1024  ;;  %p702_p12 = scmp.lt.s32.totalorder %s861_s30, %s861_s30 }
  0x1b   :  { %p698_p11 = scmp.ne.s32.totalorder %s861_s30, %s697_s26  ;;  %p703_p13 = scmp.lt.s32.totalorder %s697_s26, %s697_s26 }
  0x1d   :  { %p704_p0 = por %p703_p13, %p702_p12 }
  0x1f   :  { %p705_p1 = pnand %p704_p0, %p698_p11 }
  0x21   :  { %708 = shalt.err (!%p705_p1)
}
  0x22   :  { %s807_s1 = smov 128   ;;  %s808_s27 = smov 8  }
  0x23   :  { %60 = dma.hbm_to_vmem [thread:$0]  %s980_s4, 1024, %s861_s30, [#allocation9], %s807_s1, %s807_s1, %s808_s27  }
  0x24   :  { %s809_s9 = smov [#allocation2]   ;;  %s810_s11 = smov [#allocation7]  }
  0x25   :  { %s23_s10 = sshll.u32 %s809_s9, 4  ;;  %s43_s12 = sshll.u32 %s810_s11, 4  ;;  %s24_s10 = int_to_ptr.vmem [resolvable:$true] %s23_s10  ;;  %s44_s12 = int_to_ptr.vmem [resolvable:$true] %s43_s12 }
  0x26   :  { %s709_s15 = scalar_lea.hbm %s976_s0, 128 }
  0x27   :  { %p710_p2 = scmp.ne.s32.totalorder %s976_s0, %s709_s15  ;;  %p713_p3 = scmp.lt.u32.totalorder %s709_s15, %s976_s0 }
  0x29   :  { %p715_p4 = pnand %p713_p3, %p710_p2 }
  0x2b   :  { %718 = shalt.err (!%p715_p4)
}
  0x2c   :  { %s719_s4 = scalar_lea.vmem %s24_s10, 128  ;;  %p724_p6 = scmp.lt.s32.totalorder %s24_s10, %s24_s10 }
  0x2d   :  { %p720_p5 = scmp.ne.s32.totalorder %s24_s10, %s719_s4  ;;  %p725_p7 = scmp.lt.s32.totalorder %s719_s4, %s719_s4 }
  0x2f   :  { %p726_p8 = por %p725_p7, %p724_p6 }
  0x31   :  { %p727_p9 = pnand %p726_p8, %p720_p5 }
  0x33   :  { %730 = shalt.err (!%p727_p9)
}
  0x34   :  { %26 = dma.hbm_to_vmem [thread:$0]  %s976_s0, 128, %s24_s10, [#allocation3]  }
  0x35   :  { %s731_s23 = scalar_lea.hbm %s978_s2, 128 }
  0x36   :  { %p732_p10 = scmp.ne.s32.totalorder %s978_s2, %s731_s23  ;;  %p735_p11 = scmp.lt.u32.totalorder %s731_s23, %s978_s2 }
  0x38   :  { %p737_p12 = pnand %p735_p11, %p732_p10 }
  0x3a   :  { %740 = shalt.err (!%p737_p12)
}
  0x3b   :  { %s741_s29 = scalar_lea.vmem %s44_s12, 128  ;;  %p746_p0 = scmp.lt.s32.totalorder %s44_s12, %s44_s12 }
  0x3c   :  { %p742_p13 = scmp.ne.s32.totalorder %s44_s12, %s741_s29  ;;  %p747_p1 = scmp.lt.s32.totalorder %s741_s29, %s741_s29 }
  0x3e   :  { %p748_p2 = por %p747_p1, %p746_p0 }
  0x40   :  { %p749_p3 = pnand %p748_p2, %p742_p13 }
  0x42   :  { %752 = shalt.err (!%p749_p3)
}
  0x43   :  { %46 = dma.hbm_to_vmem [thread:$0]  %s978_s2, 128, %s44_s12, [#allocation6]  }
  0x44   :  { %s811_s10 = smov [#allocation10]   ;;  %s753_s15 = scalar_lea.hbm %s982_s6, 2048 }
  0x45   :  { %s68_s11 = sshll.u32 %s811_s10, 4  ;;  %p754_p4 = scmp.ne.s32.totalorder %s982_s6, %s753_s15  ;;  %s69_s11 = int_to_ptr.vmem [resolvable:$true] %s68_s11 }
  0x46   :  { %p757_p5 = scmp.lt.u32.totalorder %s753_s15, %s982_s6 }
  0x48   :  { %p759_p6 = pnand %p757_p5, %p754_p4 }
  0x4a   :  { %762 = shalt.err (!%p759_p6)
}
  0x4b   :  { %s763_s4 = scalar_lea.vmem %s69_s11, 2048  ;;  %p768_p8 = scmp.lt.s32.totalorder %s69_s11, %s69_s11 }
  0x4c   :  { %p764_p7 = scmp.ne.s32.totalorder %s69_s11, %s763_s4  ;;  %p769_p9 = scmp.lt.s32.totalorder %s763_s4, %s763_s4 }
  0x4e   :  { %p770_p10 = por %p769_p9, %p768_p8 }
  0x50   :  { %p771_p11 = pnand %p770_p10, %p764_p7 }
  0x52   :  { %774 = shalt.err (!%p771_p11)
}
  0x53   :  { %74 = dma.hbm_to_vmem [thread:$0]  %s982_s6, 2048, %s69_s11, [#allocation9], %s807_s1, %s807_s1, %s808_s27  }
  0x54   :  { %797 = dma.done.wait [#allocation3], 128  }
  0x55   :  { %798 = vsyncadd [#allocation3], 4294967168 }
  0x56   :  { %799 = dma.done.wait [#allocation6], 256  }
  0x57   :  { %800 = vsyncadd [#allocation6], 4294967040 }
  0x58   :  { %801 = dma.done.wait [#allocation9], 3072  }
  0x59   :  { %802 = vsyncadd [#allocation9], 4294964224  ;;  %v812_v0 = vmov 0.0|0.0   ;;  %vm813_vm0 = vmmov 0   ;;  %v814_v1 = vmov 0.0   ;;  %v96_v2 = vld [vmem:[#allocation8 + $0x10] sm:$0xff] }
  0x5a   :  { %618 = vmatprep.subr.bf16.mxu1 %v812_v0  ;;  %559 = vmatprep.mubr.msk.f32.mxu1 %vm813_vm0, %v814_v1  ;;  %v97_v3 = vld [vmem:[#allocation8 + $0x18] sm:$0xff]  ;;  %v93_v5 = vld [vmem:[#allocation8] sm:$0xff]  ;;  %v94_v6 = vld [vmem:[#allocation8 + $0x8] sm:$0xff]  ;;  %vm98_vm1 = vcmask 130048   ;;  %s815_s21 = smov [#allocation11]  }
  0x5b   :  { %630 = vmatprep.subr.bf16.mxu0 %v812_v0  ;;  %615 = vmatprep.mubr.msk.f32.mxu0 %vm813_vm0, %v814_v1  ;;  %v619_v4 = vpack.c.bf16 %v97_v3, %v96_v2  ;;  %v95_v7 = vld [vmem:[#allocation5] sm:$0xff]  ;;  %v622_v8 = vpack.c.bf16 %v94_v6, %v93_v5  ;;  %v246_v9 = vld [vmem:[#allocation8 + $0x20] sm:$0xff]  ;;  %v247_v10 = vld [vmem:[#allocation8 + $0x28] sm:$0xff]  ;;  %s509_s22 = sshll.u32 %s815_s21, 4  ;;  %s510_s22 = int_to_ptr.vmem [resolvable:$true] %s509_s22 }
  0x5c   :  { %v408_v11 = vld [vmem:[#allocation10] sm:$0xff]  ;;  %v409_v12 = vld [vmem:[#allocation10 + $0x8] sm:$0xff]  ;;  %v410_v14 = vld [vmem:[#allocation10 + $0x10] sm:$0xff]  ;;  %v625_v17 = vpack.c.bf16 %v247_v10, %v246_v9  ;;  %s775_s23 = scalar_lea.vmem %s510_s22, 128  ;;  %p780_p13 = scmp.lt.s32.totalorder %s510_s22, %s510_s22 }
  0x5d   :  { %620 = vmatpush3.bf16.msra.mxu1 %v619_v4  ;;  %v631_v13 = vpack.c.bf16 %v409_v12, %v408_v11  ;;  %v411_v15 = vld [vmem:[#allocation10 + $0x18] sm:$0xff]  ;;  %v92_v16 = vld [vmem:[#allocation2] sm:$0xff]  ;;  %v323_v18 = vld [vmem:[#allocation8 + $0x30] sm:$0xff]  ;;  %p776_p12 = scmp.ne.s32.totalorder %s510_s22, %s775_s23  ;;  %p781_p0 = scmp.lt.s32.totalorder %s775_s23, %s775_s23 }
  0x5e   :  { %621 = vmatprep.subr.bf16.mxu1 %v812_v0  ;;  %v324_v19 = vld [vmem:[#allocation8 + $0x38] sm:$0xff]  ;;  %v634_v20 = vpack.c.bf16 %v411_v15, %v410_v14  ;;  %v412_v21 = vld [vmem:[#allocation10 + $0x20] sm:$0xff]  ;;  %v413_v22 = vld [vmem:[#allocation10 + $0x28] sm:$0xff] }
  0x5f   :  { %632 = vmatpush3.bf16.msra.mxu0 %v631_v13  ;;  %v245_v23 = vld [vmem:[#allocation7] sm:$0xff]  ;;  %v628_v24 = vpack.c.bf16 %v324_v19, %v323_v18  ;;  %v637_v25 = vpack.c.bf16 %v413_v22, %v412_v21  ;;  %v322_v26 = vld [vmem:[%s979_s3] sm:$0xff]  ;;  %v414_v27 = vld [vmem:[#allocation10 + $0x30] sm:$0xff]  ;;  %p782_p1 = por %p781_p0, %p780_p13 }
  0x60   :  { %560 = vmatmul.mubr.msk.f32.vlgmr.msra.gmra.mrb[0].mxu1 %vm98_vm1, %v95_v7  ;;  %633 = vmatprep.subr.bf16.mxu0 %v812_v0  ;;  %v415_v28 = vld [vmem:[#allocation10 + $0x38] sm:$0xff]  ;;  %v416_v30 = vld [vmem:[#allocation10 + $0x40] sm:$0xff]  ;;  %v417_v31 = vld [vmem:[#allocation10 + $0x48] sm:$0xff] }
  0x61   :  { %623 = vmatpush3.bf16.msra.mxu1 %v622_v8  ;;  %566 = vmatprep.mubr.msk.f32.mxu1 %vm813_vm0, %v814_v1  ;;  %v640_v29 = vpack.c.bf16 %v415_v28, %v414_v27  ;;  %v643_v32 = vpack.c.bf16 %v417_v31, %v416_v30  ;;  %v418_v33 = vld [vmem:[#allocation10 + $0x50] sm:$0xff]  ;;  %v419_v34 = vld [vmem:[#allocation10 + $0x58] sm:$0xff]  ;;  %v420_v36 = vld [vmem:[#allocation10 + $0x60] sm:$0xff]  ;;  %p783_p2 = pnand %p782_p1, %p776_p12 }
  0x62   :  { %624 = vmatprep.subr.bf16.mxu1 %v812_v0  ;;  %v646_v35 = vpack.c.bf16 %v419_v34, %v418_v33  ;;  %v421_v37 = vld [vmem:[#allocation10 + $0x68] sm:$0xff]  ;;  %v422_v39 = vld [vmem:[#allocation10 + $0x70] sm:$0xff]  ;;  %v423_v40 = vld [vmem:[#allocation10 + $0x78] sm:$0xff] }
  0x63   :  { %635 = vmatpush3.bf16.msra.mxu0 %v634_v20  ;;  %v649_v38 = vpack.c.bf16 %v421_v37, %v420_v36  ;;  %v652_v41 = vpack.c.bf16 %v423_v40, %v422_v39  ;;  %v524_v51 = vld [vmem:[%s981_s5] ss:$0 sm:$0xff] }
  0x64   :  { %567 = vmatmul.mubr.msk.f32.vlgmr.msra.gmra.mrb[2].mxu1 %vm98_vm1, %v92_v16  ;;  %636 = vmatprep.subr.bf16.mxu0 %v812_v0  ;;  %v525_v56 = vld [vmem:[%s983_s7] ss:$0 sm:$0xff] }
  0x65   :  { %626 = vmatpush3.bf16.msra.mxu1 %v625_v17  ;;  %573 = vmatprep.mubr.msk.f32.mxu1 %vm813_vm0, %v814_v1 }
  0x66   :  { %627 = vmatprep.subr.bf16.mxu1 %v812_v0 }
  0x67   :  { %638 = vmatpush3.bf16.msra.mxu0 %v637_v25 }
  0x68   :  { %574 = vmatmul.mubr.msk.f32.vlgmr.msra.gmra.mrb[4].mxu1 %vm98_vm1, %v245_v23  ;;  %639 = vmatprep.subr.bf16.mxu0 %v812_v0 }
  0x69   :  { %629 = vmatpush3.bf16.msra.mxu1 %v628_v24  ;;  %580 = vmatprep.mubr.msk.f32.mxu1 %vm813_vm0, %v814_v1 }
  0x6b   :  { %641 = vmatpush3.bf16.msra.mxu0 %v640_v29 }
  0x6c   :  { %581 = vmatmul.mubr.msk.f32.vlgmr.msra.gmra.mrb[6].mxu1 %vm98_vm1, %v322_v26  ;;  %642 = vmatprep.subr.bf16.mxu0 %v812_v0 }
  0x6f   :  { %644 = vmatpush3.bf16.msra.mxu0 %v643_v32 }
  0x70   :  { %645 = vmatprep.subr.bf16.mxu0 %v812_v0 }
  0x73   :  { %647 = vmatpush3.bf16.msra.mxu0 %v646_v35 }
  0x74   :  { %648 = vmatprep.subr.bf16.mxu0 %v812_v0 }
  0x77   :  { %650 = vmatpush3.bf16.msra.mxu0 %v649_v38 }
  0x78   :  { %651 = vmatprep.subr.bf16.mxu0 %v812_v0 }
  0x7b   :  { %653 = vmatpush3.bf16.msra.mxu0 %v652_v41 }
 0x133   :  { %v168_v42 = vpop.f32.mrb[0].mxu1 }
 0x134   :  { %v561_v43 = vpop.f32.mrb[1].mxu1 }
 0x137   :  { %v241_v44 = vpop.f32.mrb[2].mxu1 }
 0x138   :  { %v242_v45 = vadd.f32 %v241_v44, %v168_v42  ;;  %v568_v46 = vpop.f32.mrb[3].mxu1 }
 0x13b   :  { %v317_v47 = vpop.f32.mrb[4].mxu1 }
 0x13c   :  { %v321_v48 = vadd.f32 %v317_v47, %v242_v45  ;;  %v575_v49 = vpop.f32.mrb[5].mxu1 }
 0x13f   :  { %v394_v50 = vpop.f32.mrb[6].mxu1 }
 0x140   :  { %v398_v52 = vadd.f32 %v394_v50, %v321_v48  ;;  %v582_v53 = vpop.f32.mrb[7].mxu1 }
 0x142   :  { %v406_v54 = vadd.f32 %v524_v51, %v398_v52 }
 0x144   :  { %v407_v55 = vmax.f32 %v406_v54, 0.0 }
 0x146   :  { %616 = vmatmul.mubr.f32.vlgmr.msra.gmra.mrb[0].mxu0 %v407_v55 }
 0x219   :  { %v497_v57 = vpop.f32.mrb[0].mxu0 }
 0x21a   :  { %v498_v58 = vadd.f32 %v525_v56, %v497_v57  ;;  %v617_v59 = vpop.f32.mrb[1].mxu0 }
 0x21c   :  { %v501_v60 = vmax.f32 %v498_v58, 0.0 }
 0x21e   :  { %502 = vst [vmem:[#allocation11] sm:$0xff] %v501_v60 }
 0x21f   :  { %786 = shalt.err (!%p783_p2)
}
 0x220   :  { %s787_s25 = scalar_lea.hbm %s984_s8, 128 }
 0x221   :  { %p788_p3 = scmp.ne.s32.totalorder %s984_s8, %s787_s25  ;;  %p791_p4 = scmp.lt.u32.totalorder %s787_s25, %s984_s8 }
 0x223   :  { %p793_p5 = pnand %p791_p4, %p788_p3 }
 0x225   :  { %796 = shalt.err (!%p793_p5)
}
 0x226   :  { %512 = dma.vmem_to_hbm [thread:$0]  %s510_s22, 128, %s984_s8, [#allocation4]  }
 0x227   :  { %803 = dma.done.wait [#allocation4], 128  }
 0x228   :  { %804 = vsyncadd [#allocation4], 4294967168 }
 0x229   :  { %516 = vsyncpa [#allocation3], 1 }
 0x22a   :  { %517 = vsyncpa [#allocation6], 1 }
 0x22b   :  { %518 = vsyncpa [#allocation9], 1 }
 0x22c   :  { %519 = vsyncpa [#allocation4], 1 }

</bundles_post_ra>
